<compile_context>
chip_gen: v6e
topology: v6e:2x2x1
jax: 0.10.0
libtpu: 0.0.40
codegen_flags: <defaults>
</compile_context>

<pallas_src>
import jax
import jax.numpy as jnp
from jax.experimental import pallas as pl
from jax.experimental.pallas import tpu as pltpu

_CH = 8        # sublane rows per inner compute chunk ((8, 256) f32 = 2 vregs/value)
_LANES = 256   # lanes per row = 128 batch elements, (a0, a1) interleaved


def _glu_kernel(p_ref, x_ref, o_ref):
    """One (S, 256) block of the flat interleaved input -> same-shaped output.

    p_ref : SMEM f32[12] -- [W00,W01,W10,W11, V00,V01,V10,V11, b0,b1, c0,c1]
    x_ref : VMEM (S, 256) -- a.reshape(-1) padded; even lanes = a[:,0], odd = a[:,1]
    o_ref : VMEM (S, 256) -- out.reshape(-1) in the same interleaved layout
    """
    s_rows = x_ref.shape[0]
    n_chunks = s_rows // _CH

    # ---- hoisted per-lane constants (built once per grid step) -------------
    lane = jax.lax.broadcasted_iota(jnp.int32, (_CH, _LANES), 1)
    is_even = (lane & 1) == 0                      # n = lane % 2 (output column)

    # Pair partner lives one lane away; self-calibrate pltpu.roll's rotation
    # direction with an iota so the selection is correct under either
    # convention.  roll(x, _LANES-1) is always the inverse rotation of
    # roll(x, 1), so exactly one of the two provides the partner lane.
    rolled_iota = pltpu.roll(lane, 1, axis=1)
    partner_lane = jnp.where(is_even, lane + 1, lane - 1)
    use_plus = rolled_iota == partner_lane         # take roll(x, 1) where True

    W00, W01, W10, W11 = p_ref[0], p_ref[1], p_ref[2], p_ref[3]
    V00, V01, V10, V11 = p_ref[4], p_ref[5], p_ref[6], p_ref[7]
    b0, b1, c0, c1 = p_ref[8], p_ref[9], p_ref[10], p_ref[11]

    def c01(v_even, v_odd):                        # per-lane-parity constant vector
        return jnp.where(is_even, v_even, v_odd)

    # out[2m+n] = (a[m,n]*W[n,n] + a[m,1-n]*W[1-n,n] + b[n])
    #             * sigmoid(a[m,n]*V[n,n] + a[m,1-n]*V[1-n,n] + c[n])
    wd = c01(W00, W11)   # weight on the "self" lane
    wo = c01(W10, W01)   # weight on the partner lane
    vd = c01(V00, V11)
    vo = c01(V10, V01)
    bb = c01(b0, b1)
    cc = c01(c0, c1)

    def chunk(i, carry):
        r0 = pl.multiple_of(i * _CH, _CH)
        x = x_ref[pl.ds(r0, _CH), :].astype(jnp.float32)          # (8, 256) dense
        partner = jnp.where(use_plus,
                            pltpu.roll(x, 1, axis=1),
                            pltpu.roll(x, _LANES - 1, axis=1))
        lin = x * wd + partner * wo + bb
        gate = x * vd + partner * vo + cc
        # sigmoid: exp on the EUP, divide replaced by approx reciprocal (EUP)
        sig = pl.reciprocal(1.0 + jnp.exp(-gate), approx=True)
        o_ref[pl.ds(r0, _CH), :] = (lin * sig).astype(o_ref.dtype)
        return carry

    jax.lax.fori_loop(0, n_chunks, chunk, 0, unroll=min(4, n_chunks))


def _round_up(x, m):
    return ((x + m - 1) // m) * m


def _pick_block_rows(r_rows, *, max_block_rows=2048, target_steps=4):
    """Rows (of 256 lanes) per grid step: multiple of 8, aims for >= target_steps
    grid steps (v7x megacore + pipelining), block capped so double-buffered
    in+out stays ~8 MiB, padding rebalanced to < 8*steps rows."""
    if r_rows <= 8:
        return 8
    block = min(max_block_rows, _round_up(pl.cdiv(r_rows, target_steps), 8))
    steps = pl.cdiv(r_rows, block)
    return max(8, _round_up(pl.cdiv(r_rows, steps), 8))


def glu_forward_pallas(a, b_unused, W, V, b_param, c_param, *,
                       max_block_rows=2048, target_steps=4):
    """Pallas GLU forward. `b_unused` is ignored (matches the torch module)."""
    del b_unused
    M, K = a.shape
    N = W.shape[1]
    assert K == 2 and N == 2 and W.shape == (2, 2) and V.shape == (2, 2)
    out_dtype = a.dtype

    # All 12 parameters fused into one tiny SMEM-resident vector.
    params = jnp.concatenate([
        W.reshape(-1).astype(jnp.float32),
        V.reshape(-1).astype(jnp.float32),
        b_param.reshape(-1).astype(jnp.float32),
        c_param.reshape(-1).astype(jnp.float32),
    ])                                                           # (12,)

    # Flat lane-interleaved layout (no HBM transposes): row-major a.reshape(-1)
    # already has (a[m,0], a[m,1]) adjacent, 128 batch elements per 256 lanes.
    r_rows = pl.cdiv(M, 128)
    block_rows = _pick_block_rows(r_rows, max_block_rows=max_block_rows,
                                  target_steps=target_steps)
    steps = pl.cdiv(r_rows, block_rows)
    r_pad = steps * block_rows

    flat = a.reshape(-1)                                         # free reshape
    pad = r_pad * _LANES - flat.shape[0]
    if pad:
        flat = jnp.pad(flat, (0, pad))
    x2d = flat.reshape(r_pad, _LANES)

    out2d = pl.pallas_call(
        _glu_kernel,
        out_shape=jax.ShapeDtypeStruct((r_pad, _LANES), out_dtype),
        grid=(steps,),
        in_specs=[
            pl.BlockSpec(memory_space=pltpu.MemorySpace.SMEM),        # params
            pl.BlockSpec((block_rows, _LANES), lambda i: (i, 0)),     # input
        ],
        out_specs=pl.BlockSpec((block_rows, _LANES), lambda i: (i, 0)),
        compiler_params=pltpu.CompilerParams(
            dimension_semantics=("parallel",),
        ),
    )(params, x2d)

    out = out2d.reshape(-1)
    if pad:
        out = out[:2 * M]
    return out.reshape(M, N)


def glu_forward(a, b_unused, W, V, b_param, c_param, *, min_pallas_batch=1024):
    """Dispatcher: tiny batches stay as a fused XLA GEMV chain (launch overhead
    dominates); larger batches take the Pallas kernel.  Threshold is a
    sweepable knob — re-benchmark per generation."""
    if a.shape[0] < min_pallas_batch:
        return (a @ W + b_param) * jax.nn.sigmoid(a @ V + c_param)
    return glu_forward_pallas(a, b_unused, W, V, b_param, c_param)


def activation_function_forward(x, y=None, *, W, V, b_param, c_param):
    """Mirrors ActivationFunction(activation_function='glu').forward(x, y)."""
    if y is None:
        split = x.shape[1] // 2
        x, y = x[:, :split], x[:, split:]
    return glu_forward(x, y, W, V, b_param, c_param)
    # TODO(synk): non-GLU activations (relu/gelu/mish/...) are trivial
    # elementwise ops and are intentionally left to fused XLA.


def _reference(a, W, V, b_param, c_param):
    return (a @ W + b_param) * jax.nn.sigmoid(a @ V + c_param)


if __name__ == "__main__":
    key = jax.random.PRNGKey(0)
    k_x, k_W, k_V, k_b, k_c, k_big = jax.random.split(key, 6)

    W = jax.random.normal(k_W, (2, 2), dtype=jnp.float32)
    V = jax.random.normal(k_V, (2, 2), dtype=jnp.float32)
    b_param = jax.random.normal(k_b, (2,), dtype=jnp.float32)
    c_param = jax.random.normal(k_c, (2,), dtype=jnp.float32)

    # ActivationFunction('glu')-style call: x (8, 4) split into a | b (b unused).
    x = jax.random.normal(k_x, (8, 4), dtype=jnp.float32)
    a_in, b_in = x[:, :2], x[:, 2:]
    out = jax.block_until_ready(
        glu_forward_pallas(a_in, b_in, W, V, b_param, c_param))
    ref = _reference(a_in, W, V, b_param, c_param)
    assert out.shape == ref.shape
    assert jnp.allclose(out, ref, atol=1e-2, rtol=1e-2), \
        float(jnp.max(jnp.abs(out - ref)))

    # Multi-tile grid path (grid=(4,), parallel -> megacore-shardable on v7x).
    a_big = jax.random.normal(k_big, (4096, 2), dtype=jnp.float32)
    out_big = jax.block_until_ready(
        glu_forward_pallas(a_big, None, W, V, b_param, c_param))
    ref_big = _reference(a_big, W, V, b_param, c_param)
    assert jnp.allclose(out_big, ref_big, atol=1e-2, rtol=1e-2), \
        float(jnp.max(jnp.abs(out_big - ref_big)))

    print("KERNEL_OK")
</pallas_src>

<mosaic_0001>
module attributes {stable_mosaic.version = 11 : i64} {
  func.func @_glu_kernel(%arg0: i32, %arg1: memref<12xf32, #tpu.memory_space<smem>>, %arg2: memref<8x256xf32, #tpu.memory_space<vmem>>, %arg3: memref<8x256xf32, #tpu.memory_space<vmem>>) attributes {dimension_semantics = [#tpu.dimension_semantics<parallel>], iteration_bounds = array<i64: 1>, scalar_prefetch = 0 : i64, scratch_operands = 0 : i64, tpu.core_type = #tpu.core_type<tc>, window_params = [{transform_indices = @transform_0, window_bounds = array<i64: 12>}, {transform_indices = @transform_1, window_bounds = array<i64: 8, 256>}, {transform_indices = @transform_2, window_bounds = array<i64: 8, 256>}]} {
    %0 = tpu.iota {dimensions = array<i32: 1>} : vector<8x256xi32>
    %c1_i32 = arith.constant 1 : i32
    %1 = vector.broadcast %c1_i32 : i32 to vector<8x256xi32>
    %2 = arith.andi %0, %1 : vector<8x256xi32>
    %c0_i32 = arith.constant 0 : i32
    %3 = vector.broadcast %c0_i32 : i32 to vector<8x256xi32>
    %4 = arith.cmpi eq, %2, %3 : vector<8x256xi32>
    %c1_i32_0 = arith.constant 1 : i32
    %5 = tpu.dynamic_rotate %0 by %c1_i32_0 dim 1 : vector<8x256xi32>, i32 -> vector<8x256xi32>
    %c1_i32_1 = arith.constant 1 : i32
    %6 = vector.broadcast %c1_i32_1 : i32 to vector<8x256xi32>
    %7 = arith.addi %0, %6 : vector<8x256xi32>
    %c1_i32_2 = arith.constant 1 : i32
    %8 = vector.broadcast %c1_i32_2 : i32 to vector<8x256xi32>
    %9 = arith.subi %0, %8 : vector<8x256xi32>
    %10 = arith.select %4, %7, %9 : vector<8x256xi1>, vector<8x256xi32>
    %11 = arith.cmpi eq, %5, %10 : vector<8x256xi32>
    %c0 = arith.constant 0 : index
    %12 = memref.load %arg1[%c0] : memref<12xf32, #tpu.memory_space<smem>>
    %c1 = arith.constant 1 : index
    %13 = memref.load %arg1[%c1] : memref<12xf32, #tpu.memory_space<smem>>
    %c2 = arith.constant 2 : index
    %14 = memref.load %arg1[%c2] : memref<12xf32, #tpu.memory_space<smem>>
    %c3 = arith.constant 3 : index
    %15 = memref.load %arg1[%c3] : memref<12xf32, #tpu.memory_space<smem>>
    %c4 = arith.constant 4 : index
    %16 = memref.load %arg1[%c4] : memref<12xf32, #tpu.memory_space<smem>>
    %c5 = arith.constant 5 : index
    %17 = memref.load %arg1[%c5] : memref<12xf32, #tpu.memory_space<smem>>
    %c6 = arith.constant 6 : index
    %18 = memref.load %arg1[%c6] : memref<12xf32, #tpu.memory_space<smem>>
    %c7 = arith.constant 7 : index
    %19 = memref.load %arg1[%c7] : memref<12xf32, #tpu.memory_space<smem>>
    %c8 = arith.constant 8 : index
    %20 = memref.load %arg1[%c8] : memref<12xf32, #tpu.memory_space<smem>>
    %c9 = arith.constant 9 : index
    %21 = memref.load %arg1[%c9] : memref<12xf32, #tpu.memory_space<smem>>
    %c10 = arith.constant 10 : index
    %22 = memref.load %arg1[%c10] : memref<12xf32, #tpu.memory_space<smem>>
    %c11 = arith.constant 11 : index
    %23 = memref.load %arg1[%c11] : memref<12xf32, #tpu.memory_space<smem>>
    %24 = vector.broadcast %12 : f32 to vector<8x256xf32>
    %25 = vector.broadcast %15 : f32 to vector<8x256xf32>
    %26 = arith.select %4, %24, %25 : vector<8x256xi1>, vector<8x256xf32>
    %27 = vector.broadcast %14 : f32 to vector<8x256xf32>
    %28 = vector.broadcast %13 : f32 to vector<8x256xf32>
    %29 = arith.select %4, %27, %28 : vector<8x256xi1>, vector<8x256xf32>
    %30 = vector.broadcast %16 : f32 to vector<8x256xf32>
    %31 = vector.broadcast %19 : f32 to vector<8x256xf32>
    %32 = arith.select %4, %30, %31 : vector<8x256xi1>, vector<8x256xf32>
    %33 = vector.broadcast %18 : f32 to vector<8x256xf32>
    %34 = vector.broadcast %17 : f32 to vector<8x256xf32>
    %35 = arith.select %4, %33, %34 : vector<8x256xi1>, vector<8x256xf32>
    %36 = vector.broadcast %20 : f32 to vector<8x256xf32>
    %37 = vector.broadcast %21 : f32 to vector<8x256xf32>
    %38 = arith.select %4, %36, %37 : vector<8x256xi1>, vector<8x256xf32>
    %39 = vector.broadcast %22 : f32 to vector<8x256xf32>
    %40 = vector.broadcast %23 : f32 to vector<8x256xf32>
    %41 = arith.select %4, %39, %40 : vector<8x256xi1>, vector<8x256xf32>
    %c0_i32_3 = arith.constant 0 : i32
    %c8_i32 = arith.constant 8 : i32
    %42 = arith.muli %c0_i32_3, %c8_i32 : i32
    %43 = tpu.assume_multiple %42, 8 : i32
    %44 = arith.index_cast %43 : i32 to index
    %c0_4 = arith.constant 0 : index
    %45 = vector.load %arg2[%44, %c0_4] : memref<8x256xf32, #tpu.memory_space<vmem>>, vector<8x256xf32>
    %c1_i32_5 = arith.constant 1 : i32
    %46 = tpu.dynamic_rotate %45 by %c1_i32_5 dim 1 : vector<8x256xf32>, i32 -> vector<8x256xf32>
    %c255_i32 = arith.constant 255 : i32
    %47 = tpu.dynamic_rotate %45 by %c255_i32 dim 1 : vector<8x256xf32>, i32 -> vector<8x256xf32>
    %48 = arith.select %11, %46, %47 : vector<8x256xi1>, vector<8x256xf32>
    %49 = arith.mulf %45, %26 : vector<8x256xf32>
    %50 = arith.mulf %48, %29 : vector<8x256xf32>
    %51 = arith.addf %49, %50 : vector<8x256xf32>
    %52 = arith.addf %51, %38 : vector<8x256xf32>
    %53 = arith.mulf %45, %32 : vector<8x256xf32>
    %54 = arith.mulf %48, %35 : vector<8x256xf32>
    %55 = arith.addf %53, %54 : vector<8x256xf32>
    %56 = arith.addf %55, %41 : vector<8x256xf32>
    %cst = arith.constant 0.000000e+00 : f32
    %57 = vector.broadcast %cst : f32 to vector<8x256xf32>
    %58 = arith.subf %57, %56 : vector<8x256xf32>
    %59 = math.exp %58 : vector<8x256xf32>
    %cst_6 = arith.constant 1.000000e+00 : f32
    %60 = vector.broadcast %cst_6 : f32 to vector<8x256xf32>
    %61 = arith.addf %60, %59 : vector<8x256xf32>
    %62 = tpu.reciprocal %61 {approx = true} : vector<8x256xf32> -> vector<8x256xf32>
    %63 = arith.mulf %52, %62 : vector<8x256xf32>
    %64 = arith.index_cast %43 : i32 to index
    %c0_7 = arith.constant 0 : index
    %65 = vector.load %arg3[%64, %c0_7] : memref<8x256xf32, #tpu.memory_space<vmem>>, vector<8x256xf32>
    tpu.vector_store %arg3[%64, %c0_7], %63 {strides = array<i32>} : memref<8x256xf32, #tpu.memory_space<vmem>>, vector<8x256xf32>,
    %c1_i32_8 = arith.constant 1 : i32
    return
  }
  func.func @transform_0(%arg0: i32) -> i32 {
    %c0_i32 = arith.constant 0 : i32
    %c0_i32_0 = arith.constant 0 : i32
    return %c0_i32 : i32
  }
  func.func @transform_1(%arg0: i32) -> (i32, i32) {
    %c0_i32 = arith.constant 0 : i32
    %c0_i32_0 = arith.constant 0 : i32
    return %arg0, %c0_i32 : i32, i32
  }
  func.func @transform_2(%arg0: i32) -> (i32, i32) {
    %c0_i32 = arith.constant 0 : i32
    %c0_i32_0 = arith.constant 0 : i32
    return %arg0, %c0_i32 : i32, i32
  }
}

</mosaic_0001>

<bundles_post_ra>
// kernel: tpu_custom_call.1
= control target key start
LH: loop header
LB: loop body
LE: loop exit
PB: predicated region body
PF: predicated region fallthrough
CT: control target
= control target key end

     0   :  { %7 = vsyncpa [#allocation5], 0  ;;  %s354_s0 = inlined_call_operand.hbm [shape: f32[12], index: 0, kind: input, shape index: {}]   ;;  %s355_s1 = inlined_call_operand.hbm [shape: f32[8,256], index: 1, kind: input, shape index: {}]   ;;  %s356_s2 = inlined_call_operand.hbm [shape: f32[8,256], index: 2, kind: output, shape index: {}]  }
   0x1   :  { %8 = vsyncpa [#allocation3], 0 }
   0x2   :  { %9 = vsyncpa [#allocation4], 0  ;;  %s241_s9 = smov [#allocation2]   ;;  %s242_s12 = smov [#allocation6]  }
   0x3   :  { %17 = dma.hbm_to_smem %s354_s0, 16, %s241_s9, [#allocation5]  }
   0x4   :  { %s24_s13 = sshll.u32 %s242_s12, 4  ;;  %s25_s13 = int_to_ptr.vmem [resolvable:$true] %s24_s13 }
   0x5   :  { %s203_s14 = scalar_lea.vmem %s25_s13, 256  ;;  %p208_p1 = scmp.lt.s32.totalorder %s25_s13, %s25_s13 }
   0x6   :  { %p204_p0 = scmp.ne.s32.totalorder %s25_s13, %s203_s14  ;;  %p209_p2 = scmp.lt.s32.totalorder %s203_s14, %s203_s14 }
   0x8   :  { %p210_p3 = por %p209_p2, %p208_p1 }
   0xa   :  { %p211_p4 = pnand %p210_p3, %p204_p0 }
   0xc   :  { %214 = shalt.err (!%p211_p4)
}
   0xd   :  { %27 = dma.hbm_to_vmem [thread:$0]  %s355_s1, 256, %s25_s13, [#allocation3]  }
   0xe   :  { %235 = dma.done.wait [#allocation5], 16  }
   0xf   :  { %236 = vsyncadd [#allocation5], 4294967280 }
  0x10   :  { %237 = dma.done.wait [#allocation3], 256  }
  0x11   :  { %238 = vsyncadd [#allocation3], 4294967040 }
  0x12   :  { %34 = sfence }
  0x13   :  { %s57_s0 = sld [smem:[#allocation2]]  ;;  %v96_v0 = vld [vmem:[#allocation6] sm:$0xff]  ;;  %v35_v1 = vlaneseq  ;;  %s243_s18 = smov 1   ;;  %v97_v3 = vld [vmem:[#allocation6 + $0x8] sm:$0xff] }
  0x14   :  { %s165_s17 = sld [smem:[#allocation2 + $0x3]]  ;;  %98 = vrot.lane.b32.xlu1 %v96_v0, %s243_s18  ;;  %s244_s1 = smov 127  }
  0x15   :  { %s166_s19 = sld [smem:[#allocation2 + $0x4]]  ;;  %v267_v2 = vand.u32 127, %v35_v1  ;;  %s245_s29 = smov [#allocation7]  }
  0x16   :  { %s169_s20 = sld [smem:[#allocation2 + $0x7]]  ;;  %s151_s30 = sshll.u32 %s245_s29, 4  ;;  %s152_s30 = int_to_ptr.vmem [resolvable:$true] %s151_s30 }
  0x17   :  { %v38_v4 = vand.u32 1, %v267_v2  ;;  %42 = vrot.lane.b32.xlu0 %v267_v2, %s243_s18  ;;  %v37_v5 = vadd.s32 128, %v267_v2  ;;  %s290_s21 = sld [smem:[#allocation2 + $0x1]]  ;;  %v49_v26 = vadd.s32 1, %v267_v2  ;;  %v161_v27 = vadd.s32 4294967295, %v267_v2  ;;  %s215_s3 = scalar_lea.vmem %s152_s30, 256 }
  0x18   :  { %100 = vrot.lane.b32.xlu1 %v97_v3, %s243_s18  ;;  %s292_s22 = sld [smem:[#allocation2 + $0x2]]  ;;  %vm46_vm2 = vcmp.lt.s32.totalorder %v267_v2, 1  ;;  %vm108_vm3 = vcmp.lt.s32.totalorder %v267_v2, 127  ;;  %p216_p5 = scmp.ne.s32.totalorder %s152_s30, %s215_s3 }
  0x19   :  { %v69_v6 = vstv %s57_s0  ;;  %v39_v7 = vand.u32 1, %v37_v5  ;;  %vm272_vm0 = vcmp.eq.s32.totalorder %v38_v4, 0  ;;  %s167_s23 = sld [smem:[#allocation2 + $0x5]]  ;;  %v50_v22 = vadd.s32 1, %v37_v5  ;;  %p220_p6 = scmp.lt.s32.totalorder %s152_s30, %s152_s30 }
  0x1a   :  { %v70_v8 = vstv %s165_s17  ;;  %s168_s24 = sld [smem:[#allocation2 + $0x6]]  ;;  %v162_v23 = vadd.s32 4294967295, %v37_v5  ;;  %v53_v35 = vsel %vm272_vm0, %v49_v26, %v161_v27  ;;  %p221_p7 = scmp.lt.s32.totalorder %s215_s3, %s215_s3 }
  0x1b   :  { %v77_v10 = vstv %s166_s19  ;;  %v71_v11 = vsel %vm272_vm0, %v69_v6, %v70_v8  ;;  %vm278_vm1 = vcmp.eq.s32.totalorder %v39_v7, 0  ;;  %44 = vrot.lane.b32.xlu0 %v37_v5, %s243_s18  ;;  %s294_s25 = sld [smem:[#allocation2 + $0xa]] }
  0x1c   :  { %v78_v13 = vstv %s169_s20  ;;  %v282_v14 = vmul.f32 %v96_v0, %v71_v11  ;;  %v72_v15 = vsel %vm278_vm1, %v69_v6, %v70_v8  ;;  %106 = vrot.lane.b32.xlu1 %v97_v3, %s244_s1  ;;  %s296_s26 = sld [smem:[#allocation2 + $0xb]]  ;;  %v54_v28 = vsel %vm278_vm1, %v50_v22, %v162_v23  ;;  %p222_p8 = por %p221_p7, %p220_p6 }
  0x1d   :  { %v79_v16 = vsel %vm272_vm0, %v77_v10, %v78_v13  ;;  %v80_v17 = vsel %vm278_vm1, %v77_v10, %v78_v13  ;;  %v114_v18 = vmul.f32 %v97_v3, %v72_v15  ;;  %s298_s27 = sld [smem:[#allocation2 + $0x8]]  ;;  %v74_v30 = vstv %s290_s21 }
  0x1e   :  { %v121_v19 = vmul.f32 %v96_v0, %v79_v16  ;;  %v122_v20 = vmul.f32 %v97_v3, %v80_v17  ;;  %s300_s28 = sld [smem:[#allocation2 + $0x9]]  ;;  %v73_v29 = vstv %s292_s22  ;;  %p223_p9 = pnand %p222_p8, %p216_p5 }
  0x1f   :  { %104 = vrot.lane.b32.xlu0 %v96_v0, %s244_s1  ;;  %v82_v33 = vstv %s167_s23  ;;  %v75_v39 = vsel %vm272_vm0, %v73_v29, %v74_v30  ;;  %v76_v42 = vsel %vm278_vm1, %v73_v29, %v74_v30 }
  0x20   :  { %v81_v32 = vstv %s168_s24 }
  0x21   :  { %v83_v40 = vsel %vm272_vm0, %v81_v32, %v82_v33  ;;  %v89_v41 = vstv %s294_s25  ;;  %v84_v43 = vsel %vm278_vm1, %v81_v32, %v82_v33 }
  0x22   :  { %v90_v45 = vstv %s296_s26 }
  0x23   :  { %v85_v47 = vstv %s298_s27  ;;  %v91_v58 = vsel %vm272_vm0, %v89_v41, %v90_v45  ;;  %v92_v59 = vsel %vm278_vm1, %v89_v41, %v90_v45 }
  0x24   :  { %v86_v48 = vstv %s300_s28 }
  0x25   :  { %v87_v60 = vsel %vm272_vm0, %v85_v47, %v86_v48  ;;  %v88_v61 = vsel %vm278_vm1, %v85_v47, %v86_v48 }
  0x86   :  { %v99_v21 = vpop.permute.xlu1 %98 }
  0x89   :  { %v43_v24 = vpop.permute.xlu0 %42 }
  0x8a   :  { %v101_v25 = vpop.permute.xlu1 %100 }
  0x8b   :  { %v102_v44 = vsel %vm46_vm2, %v99_v21, %v101_v25  ;;  %v103_v49 = vsel %vm46_vm2, %v101_v25, %v99_v21 }
  0x8d   :  { %v45_v31 = vpop.permute.xlu0 %44 }
  0x8e   :  { %v47_v34 = vsel %vm46_vm2, %v43_v24, %v45_v31  ;;  %v48_v36 = vsel %vm46_vm2, %v45_v31, %v43_v24  ;;  %v107_v38 = vpop.permute.xlu1 %106 }
  0x8f   :  { %vm316_vm4 = vcmp.eq.s32.totalorder %v47_v34, %v54_v28  ;;  %vm55_vm5 = vcmp.eq.s32.totalorder %v48_v36, %v53_v35 }
  0x91   :  { %v105_v46 = vpop.permute.xlu0 %104 }
  0x92   :  { %v109_v50 = vsel %vm108_vm3, %v105_v46, %v107_v38  ;;  %v110_v51 = vsel %vm108_vm3, %v107_v38, %v105_v46 }
  0x93   :  { %v111_v52 = vsel %vm55_vm5, %v103_v49, %v109_v50  ;;  %v112_v53 = vsel %vm316_vm4, %v102_v44, %v110_v51 }
  0x94   :  { %v115_v54 = vmul.f32 %v111_v52, %v75_v39  ;;  %v116_v55 = vmul.f32 %v112_v53, %v76_v42  ;;  %v123_v56 = vmul.f32 %v111_v52, %v83_v40  ;;  %v124_v57 = vmul.f32 %v112_v53, %v84_v43 }
  0x96   :  { %v125_v62 = vadd.f32 %v123_v56, %v121_v19  ;;  %v126_v63 = vadd.f32 %v124_v57, %v122_v20  ;;  %v117_v0 = vadd.f32 %v115_v54, %v282_v14  ;;  %v118_v1 = vadd.f32 %v116_v55, %v114_v18 }
  0x98   :  { %v127_v2 = vadd.f32 %v125_v62, %v91_v58  ;;  %v128_v3 = vadd.f32 %v126_v63, %v92_v59  ;;  %v119_v4 = vadd.f32 %v117_v0, %v87_v60  ;;  %v120_v5 = vadd.f32 %v118_v1, %v88_v61 }
  0x9a   :  { %v129_v6 = vsub.f32 0.0, %v127_v2  ;;  %v130_v7 = vsub.f32 0.0, %v128_v3 }
  0x9c   :  { %v131_v8 = vmul.f32 1.442695, %v129_v6  ;;  %v133_v10 = vmul.f32 1.442695, %v130_v7 }
  0x9e   :  { %179 = vpow2.f32 %v131_v8 }
  0x9f   :  { %181 = vpow2.f32 %v133_v10 }
  0xab   :  { %v180_v9 = vpop.eup %179 }
  0xac   :  { %v182_v11 = vpop.eup %181  ;;  %v135_v13 = vadd.f32 1.0, %v180_v9 }
  0xad   :  { %v136_v12 = vadd.f32 1.0, %v182_v11 }
  0xae   :  { %183 = vrcp.f32 %v135_v13 }
  0xaf   :  { %185 = vrcp.f32 %v136_v12 }
  0xbb   :  { %v184_v14 = vpop.eup %183 }
  0xbc   :  { %v186_v15 = vpop.eup %185  ;;  %v139_v16 = vmul.f32 %v184_v14, %v119_v4 }
  0xbd   :  { %v140_v17 = vmul.f32 %v186_v15, %v120_v5 }
  0xbe   :  { %143 = vst [vmem:[#allocation7] sm:$0xff] %v139_v16 }
  0xbf   :  { %144 = vst [vmem:[#allocation7 + $0x8] sm:$0xff] %v140_v17 }
  0xc0   :  { %226 = shalt.err (!%p223_p9)
}
  0xc1   :  { %154 = dma.vmem_to_hbm [thread:$0]  %s152_s30, 256, %s356_s2, [#allocation4]  }
  0xc2   :  { %239 = dma.done.wait [#allocation4], 256  }
  0xc3   :  { %240 = vsyncadd [#allocation4], 4294967040 }
  0xc4   :  { %158 = vsyncpa [#allocation3], 1 }
  0xc5   :  { %159 = vsyncpa [#allocation4], 1 }
  0xc6   :  { %160 = vsyncpa [#allocation5], 1 }

</bundles_post_ra>
